<compile_context>
chip_gen: v7x
topology: tpu7x:2x2x1
jax: 0.10.0
libtpu: 0.0.40
codegen_flags: <defaults>
</compile_context>

<pallas_src>
import functools

import jax
import jax.numpy as jnp
from jax.experimental import pallas as pl
from jax.experimental.pallas import tpu as pltpu


_TARGET_BLOCK_BYTES = 4 * 1024 * 1024   # ~4 MiB streaming blocks (amortizes per-step overhead on v7x)
_FUSED_MAX_BYTES = 4 * 1024 * 1024      # single-block fused path for VMEM-resident tensors
_VMEM_LIMIT_BYTES = 64 * 1024 * 1024    # cap only; actual use stays well under v7x's 64 MiB physical
_CORE_SPLIT = 2                         # leading "parallel" axis in pass 1 (megacore on v7x)


def _choose_layout(n_main, itemsize):
    """Lane-dense (rows, cols) view of the 128-aligned prefix plus the row tile."""
    cols = 128
    for c in (2048, 1024, 512, 256):
        if n_main % c == 0:
            cols = c
            break
    rows = n_main // cols
    # Row tile sized for ~4 MiB blocks, multiple of 32 (covers f32/bf16/int8 packing).
    target_rows = max(32, (_TARGET_BLOCK_BYTES // (cols * itemsize)) // 32 * 32)
    tile_rows = rows if rows <= target_rows else target_rows
    return rows, cols, tile_rows


def _absmax_leaky_kernel(x_ref, o_ref, *, rows, tile_rows, inner, slope):
    """Accumulate max(|leaky_relu(x)|) into a per-core (8,128) resident output block."""
    c = pl.program_id(0)
    i = pl.program_id(1)

    @pl.when(i == 0)
    def _init():
        o_ref[...] = jnp.zeros_like(o_ref)

    x = x_ref[...].astype(jnp.float32)
    # abs(leaky_relu(x)) == max(x, -slope * x) for 0 < slope < 1: one mul + one max.
    a = jnp.maximum(x, -slope * x)

    if rows % tile_rows == 0:
        # tile_rows divides rows: no partial block, no masking anywhere.
        o_ref[...] = jnp.maximum(o_ref[...], jnp.max(a))
    else:
        row0 = (c * inner + i) * tile_rows
        partial = row0 + tile_rows > rows

        @pl.when(jnp.logical_not(partial))
        def _full():
            o_ref[...] = jnp.maximum(o_ref[...], jnp.max(a))

        @pl.when(partial)  # only the last (partial) block pays for the iota/where mask
        def _masked_last():
            row_ids = jax.lax.broadcasted_iota(jnp.int32, a.shape, 0) + row0
            a_m = jnp.where(row_ids < rows, a, 0.0)
            o_ref[...] = jnp.maximum(o_ref[...], jnp.max(a_m))


def _quant_leaky_relu_kernel(params_ref, x_ref, o_ref, *, slope, min_int, max_int):
    """Fused leaky_relu + signed-int fake-quant; params = [scale, 1/scale] in SMEM."""
    scale = params_ref[0]
    inv_scale = params_ref[1]
    x = x_ref[...].astype(jnp.float32)
    y = jnp.maximum(x, slope * x)          # leaky_relu for 0 < slope < 1
    q = jnp.clip(jnp.round(y * inv_scale), min_int, max_int)
    o_ref[...] = (q * scale).astype(o_ref.dtype)


def _fused_quant_leaky_relu_kernel(x_ref, o_ref, *, slope, min_int, max_int):
    """Single-block path: compute threshold and fake-quant in one pass (one HBM read)."""
    x = x_ref[...].astype(jnp.float32)
    y = jnp.maximum(x, slope * x)                           # leaky_relu
    thr = jnp.maximum(jnp.max(jnp.maximum(x, -slope * x)), 1e-8)  # abs-max of leaky_relu
    scale = thr / max_int
    inv_scale = max_int / thr
    q = jnp.clip(jnp.round(y * inv_scale), min_int, max_int)
    o_ref[...] = (q * scale).astype(o_ref.dtype)


def quant_leaky_relu(x: jnp.ndarray, bits: int = 4, negative_slope: float = 0.01,
                     threshold=None) -> jnp.ndarray:
    """QuantLeakyReLU forward: leaky_relu + per-tensor signed fake-quant (Pallas TPU)."""
    if bits < 2:
        raise ValueError("bits must be >= 2 for a signed quantizer (max_int > 0)")
    slope = float(negative_slope)
    if not (0.0 < slope < 1.0):
        raise ValueError("negative_slope must be in (0, 1) (leaky_relu default is 0.01)")

    orig_shape = x.shape
    orig_dtype = x.dtype
    n = x.size
    itemsize = jnp.dtype(orig_dtype).itemsize
    max_int = float(2 ** (bits - 1) - 1)
    min_int = float(-(2 ** (bits - 1)))

    x_flat = x.reshape(-1)
    tail_len = n % 128
    n_main = n - tail_len

    if n_main == 0:
        # Degenerate (<128 elements): plain JAX, not worth a kernel launch.
        xf = x_flat.astype(jnp.float32)
        y = jnp.maximum(xf, slope * xf)
        if threshold is None:
            threshold = jnp.max(jnp.maximum(xf, -slope * xf))
        thr = jnp.maximum(jnp.asarray(threshold, jnp.float32), 1e-8)
        scale = thr / max_int
        q = jnp.clip(jnp.round(y * (max_int / thr)), min_int, max_int)
        return (q * scale).astype(orig_dtype).reshape(orig_shape)

    rows, cols, tile_rows = _choose_layout(n_main, itemsize)
    x_main = x_flat[:n_main].reshape(rows, cols)      # lane-dense view (no pad/concat)
    x_tail = x_flat[n_main:]                          # < 128 elements; plain-JAX below

    # --- Fused single-block path: one kernel, one HBM read of x. ---
    if threshold is None and tail_len == 0 and n_main * itemsize <= _FUSED_MAX_BYTES:
        out2d = pl.pallas_call(
            functools.partial(_fused_quant_leaky_relu_kernel, slope=slope,
                              min_int=min_int, max_int=max_int),
            out_shape=jax.ShapeDtypeStruct((rows, cols), orig_dtype),
            grid_spec=pltpu.PrefetchScalarGridSpec(
                num_scalar_prefetch=0,
                grid=(1,),
                in_specs=[pl.BlockSpec((rows, cols), lambda i: (0, 0))],
                out_specs=pl.BlockSpec((rows, cols), lambda i: (0, 0)),
            ),
            compiler_params=pltpu.CompilerParams(
                dimension_semantics=("arbitrary",),
                vmem_limit_bytes=_VMEM_LIMIT_BYTES,
            ),
        )(x_main)
        return out2d.reshape(orig_shape)

    nblocks = pl.cdiv(rows, tile_rows)

    if threshold is None:
        # Pass 1: per-tensor abs-max of leaky_relu(x) (runtime-percentile proxy).
        # Leading "parallel" axis lets v7x's 2 TensorCores split the reduction; on
        # 1-TC chips it just runs sequentially. Split only when it divides evenly.
        split = _CORE_SPLIT if nblocks % _CORE_SPLIT == 0 else 1
        inner = nblocks // split
        absmax = pl.pallas_call(
            functools.partial(_absmax_leaky_kernel, rows=rows, tile_rows=tile_rows,
                              inner=inner, slope=slope),
            out_shape=jax.ShapeDtypeStruct((8 * split, 128), jnp.float32),
            grid_spec=pltpu.PrefetchScalarGridSpec(
                num_scalar_prefetch=0,
                grid=(split, inner),
                in_specs=[pl.BlockSpec((tile_rows, cols),
                                       lambda c, i: (c * inner + i, 0))],
                out_specs=pl.BlockSpec((8, 128), lambda c, i: (c, 0)),
            ),
            compiler_params=pltpu.CompilerParams(
                dimension_semantics=("parallel", "arbitrary"),
                vmem_limit_bytes=_VMEM_LIMIT_BYTES,
            ),
        )(x_main)
        threshold = jnp.max(absmax)
        if tail_len:
            xt = x_tail.astype(jnp.float32)
            threshold = jnp.maximum(threshold, jnp.max(jnp.maximum(xt, -slope * xt)))

    thr = jnp.maximum(jnp.asarray(threshold, jnp.float32), 1e-8)
    scale = thr / max_int
    params = jnp.stack([scale, max_int / thr]).astype(jnp.float32)   # (2,) -> SMEM

    # Pass 2: fused elementwise leaky_relu + fake-quant over lane-dense ~4 MiB blocks.
    out2d = pl.pallas_call(
        functools.partial(_quant_leaky_relu_kernel, slope=slope,
                          min_int=min_int, max_int=max_int),
        out_shape=jax.ShapeDtypeStruct((rows, cols), orig_dtype),
        grid_spec=pltpu.PrefetchScalarGridSpec(
            num_scalar_prefetch=0,
            grid=(nblocks,),
            in_specs=[
                pl.BlockSpec(memory_space=pltpu.MemorySpace.SMEM),       # params
                pl.BlockSpec((tile_rows, cols), lambda i: (i, 0)),       # x
            ],
            out_specs=pl.BlockSpec((tile_rows, cols), lambda i: (i, 0)),
        ),
        compiler_params=pltpu.CompilerParams(
            dimension_semantics=("parallel",),
            vmem_limit_bytes=_VMEM_LIMIT_BYTES,
        ),
    )(params, x_main)

    out_flat = out2d.reshape(-1)
    if tail_len:
        xt = x_tail.astype(jnp.float32)
        yt = jnp.maximum(xt, slope * xt)
        qt = jnp.clip(jnp.round(yt * (max_int / thr)), min_int, max_int)
        out_flat = jnp.concatenate([out_flat, (qt * scale).astype(orig_dtype)])
    return out_flat.reshape(orig_shape)


if __name__ == "__main__":
    bits = 4
    slope = 0.01
    max_int = float(2 ** (bits - 1) - 1)
    min_int = float(-(2 ** (bits - 1)))

    def reference(x):
        y_lr = jnp.where(x >= 0, x, slope * x)
        thr = jnp.maximum(jnp.max(jnp.abs(y_lr)).astype(jnp.float32), 1e-8)
        scale = thr / max_int
        q = jnp.clip(jnp.round(y_lr * (max_int / thr)), min_int, max_int)
        return (q * scale).astype(x.dtype)

    key = jax.random.PRNGKey(0)
    k1, k2 = jax.random.split(key)

    # Small activation-shaped tensor (NCHW): exercises the single-block fused path.
    x_small = jax.random.normal(k1, (2, 4, 16, 16), dtype=jnp.float32)
    y_small = jax.block_until_ready(quant_leaky_relu(x_small, bits=bits, negative_slope=slope))
    assert y_small.shape == x_small.shape and y_small.dtype == x_small.dtype
    assert jnp.allclose(y_small, reference(x_small), atol=1e-6), "fused-path mismatch"

    # Larger tensor (> one block): exercises the two-pass streaming path, the
    # megacore-split reduction grid and the masked partial last block.
    x_big = jax.random.normal(k2, (4, 18, 128, 128), dtype=jnp.float32)
    y_big = jax.block_until_ready(quant_leaky_relu(x_big, bits=bits, negative_slope=slope))
    assert y_big.shape == x_big.shape and y_big.dtype == x_big.dtype
    assert jnp.allclose(y_big, reference(x_big), atol=1e-6), "two-pass mismatch"

    print("KERNEL_OK")
</pallas_src>

<mosaic_0001>
module attributes {stable_mosaic.version = 11 : i64} {
  func.func @_fused_quant_leaky_relu_kernel(%arg0: i32, %arg1: memref<1x2048xf32, #tpu.memory_space<vmem>>, %arg2: memref<1x2048xf32, #tpu.memory_space<vmem>>) attributes {dimension_semantics = [#tpu.dimension_semantics<arbitrary>], iteration_bounds = array<i64: 1>, scalar_prefetch = 0 : i64, scratch_operands = 0 : i64, tpu.core_type = #tpu.core_type<tc>, window_params = [{pipeline_mode = #tpu.pipeline_mode<synchronous>, transform_indices = @transform_0, window_bounds = array<i64: 1, 2048>}, {pipeline_mode = #tpu.pipeline_mode<synchronous>, transform_indices = @transform_1, window_bounds = array<i64: 1, 2048>}]} {
    %c0 = arith.constant 0 : index
    %c0_0 = arith.constant 0 : index
    %0 = vector.load %arg1[%c0, %c0_0] : memref<1x2048xf32, #tpu.memory_space<vmem>>, vector<1x2048xf32>
    %cst = arith.constant 0.00999999977 : f32
    %1 = vector.broadcast %cst : f32 to vector<1x2048xf32>
    %2 = arith.mulf %1, %0 : vector<1x2048xf32>
    %3 = arith.maximumf %0, %2 : vector<1x2048xf32>
    %cst_1 = arith.constant -0.00999999977 : f32
    %4 = vector.broadcast %cst_1 : f32 to vector<1x2048xf32>
    %5 = arith.mulf %4, %0 : vector<1x2048xf32>
    %6 = arith.maximumf %0, %5 : vector<1x2048xf32>
    %7 = vector.shape_cast %6 : vector<1x2048xf32> to vector<1x1x2048xf32>
    %cst_2 = arith.constant dense<0xFF800000> : vector<1xf32>
    %8 = vector.multi_reduction <maximumf>, %7, %cst_2 [1, 2] : vector<1x1x2048xf32> to vector<1xf32>
    %9 = vector.shape_cast %8 : vector<1xf32> to vector<1x1x1xf32>
    %10 = vector.extract %9[0, 0, 0] : f32 from vector<1x1x1xf32>
    %cst_3 = arith.constant 9.99999993E-9 : f32
    %11 = arith.maximumf %10, %cst_3 : f32
    %cst_4 = arith.constant 7.000000e+00 : f32
    %12 = arith.divf %11, %cst_4 : f32
    %cst_5 = arith.constant 7.000000e+00 : f32
    %13 = arith.divf %cst_5, %11 : f32
    %14 = vector.broadcast %13 : f32 to vector<1x2048xf32>
    %15 = arith.mulf %3, %14 : vector<1x2048xf32>
    %16 = math.roundeven %15 : vector<1x2048xf32>
    %cst_6 = arith.constant -8.000000e+00 : f32
    %cst_7 = arith.constant 7.000000e+00 : f32
    %17 = vector.broadcast %cst_6 : f32 to vector<1x2048xf32>
    %18 = arith.maximumf %17, %16 : vector<1x2048xf32>
    %19 = vector.broadcast %cst_7 : f32 to vector<1x2048xf32>
    %20 = arith.minimumf %19, %18 : vector<1x2048xf32>
    %21 = vector.broadcast %12 : f32 to vector<1x2048xf32>
    %22 = arith.mulf %20, %21 : vector<1x2048xf32>
    %c0_8 = arith.constant 0 : index
    %c0_9 = arith.constant 0 : index
    %23 = vector.load %arg2[%c0_8, %c0_9] : memref<1x2048xf32, #tpu.memory_space<vmem>>, vector<1x2048xf32>
    tpu.vector_store %arg2[%c0_8, %c0_9], %22 {strides = array<i32>} : memref<1x2048xf32, #tpu.memory_space<vmem>>, vector<1x2048xf32>,
    return
  }
  func.func @transform_0(%arg0: i32) -> (i32, i32) {
    %c0_i32 = arith.constant 0 : i32
    %c0_i32_0 = arith.constant 0 : i32
    %c0_i32_1 = arith.constant 0 : i32
    return %c0_i32, %c0_i32_0 : i32, i32
  }
  func.func @transform_1(%arg0: i32) -> (i32, i32) {
    %c0_i32 = arith.constant 0 : i32
    %c0_i32_0 = arith.constant 0 : i32
    %c0_i32_1 = arith.constant 0 : i32
    return %c0_i32, %c0_i32_0 : i32, i32
  }
}

</mosaic_0001>

<bundles_post_ra>
// kernel: tpu_custom_call.1
= control target key start
LH: loop header
LB: loop body
LE: loop exit
PB: predicated region body
PF: predicated region fallthrough
CT: control target
= control target key end

     0   :  { %6 = vsyncpa [#allocation3], 0  ;;  %s315_s0 = inlined_call_operand.hbm [shape: f32[1,2048], index: 0, kind: input, shape index: {}]   ;;  %s316_s1 = inlined_call_operand.hbm [shape: f32[1,2048], index: 1, kind: output, shape index: {}]  }
   0x1   :  { %7 = vsyncpa [#allocation4], 0  ;;  %s250_s6 = smov [#allocation2]   ;;  %s202_s10 = scalar_lea.hbm %s315_s0, 256 }
   0x2   :  { %s14_s7 = sshll.u32 %s250_s6, 4  ;;  %p203_p0 = scmp.ne.s32.totalorder %s315_s0, %s202_s10  ;;  %s15_s7 = int_to_ptr.vmem [resolvable:$true] %s14_s7 }
   0x3   :  { %p206_p1 = scmp.lt.u32.totalorder %s202_s10, %s315_s0 }
   0x5   :  { %p208_p2 = pnand %p206_p1, %p203_p0 }
   0x7   :  { %211 = shalt.err (!%p208_p2)
}
   0x8   :  { %s212_s15 = scalar_lea.vmem %s15_s7, 256  ;;  %p217_p4 = scmp.lt.s32.totalorder %s15_s7, %s15_s7 }
   0x9   :  { %p213_p3 = scmp.ne.s32.totalorder %s15_s7, %s212_s15  ;;  %p218_p5 = scmp.lt.s32.totalorder %s212_s15, %s212_s15 }
   0xb   :  { %p219_p6 = por %p218_p5, %p217_p4 }
   0xd   :  { %p220_p7 = pnand %p219_p6, %p213_p3 }
   0xf   :  { %223 = shalt.err (!%p220_p7)
}
  0x10   :  { %17 = dma.hbm_to_vmem [thread:$0]  %s315_s0, 256, %s15_s7, [#allocation3]  }
  0x11   :  { %246 = dma.done.wait [#allocation3], 256  }
  0x12   :  { %247 = vsyncadd [#allocation3], 4294967040  ;;  %v33_v0 = vlaneseq  ;;  %v275_v2 = vld [vmem:[#allocation2] sm:$0xff]  ;;  %v277_v3 = vld [vmem:[#allocation2 + $0x8] sm:$0xff]  ;;  %vm113_vm0 = vcmask 1040384   ;;  %s252_s23 = smov [#allocation5]  }
  0x13   :  { %v27_v6 = vmul.f32 -0.01, %v275_v2  ;;  %v28_v7 = vmul.f32 -0.01, %v277_v3  ;;  %s251_s18 = smov 1e-08  }
  0x14   :  { %v34_v1 = vshrl.u32 %v33_v0, 7  ;;  %s182_s24 = sshll.u32 %s252_s23, 4  ;;  %s183_s24 = int_to_ptr.vmem [resolvable:$true] %s182_s24 }
  0x15   :  { %v29_v14 = vmax.f32 %v275_v2, %v27_v6  ;;  %v30_v15 = vmax.f32 %v277_v3, %v28_v7  ;;  %s224_s25 = scalar_lea.vmem %s183_s24, 256  ;;  %p229_p9 = scmp.lt.s32.totalorder %s183_s24, %s183_s24 }
  0x16   :  { %v35_v4 = vsub.s32 0, %v34_v1  ;;  %v39_v5 = vsub.s32 1, %v34_v1  ;;  %v43_v8 = vsub.s32 2, %v34_v1  ;;  %v47_v9 = vsub.s32 3, %v34_v1  ;;  %p225_p8 = scmp.ne.s32.totalorder %s183_s24, %s224_s25  ;;  %p230_p10 = scmp.lt.s32.totalorder %s224_s25, %s224_s25 }
  0x17   :  { %v51_v10 = vsub.s32 4, %v34_v1  ;;  %v55_v11 = vsub.s32 5, %v34_v1  ;;  %v59_v12 = vsub.s32 6, %v34_v1  ;;  %v63_v13 = vsub.s32 7, %v34_v1 }
  0x18   :  { %v36_v16 = vrot.slane %v29_v14, %v35_v4  ;;  %v40_v17 = vrot.slane %v29_v14, %v39_v5  ;;  %v44_v18 = vrot.slane %v29_v14, %v43_v8  ;;  %v48_v19 = vrot.slane %v29_v14, %v47_v9  ;;  %p231_p11 = por %p230_p10, %p229_p9 }
  0x19   :  { %v52_v20 = vrot.slane %v29_v14, %v51_v10  ;;  %v56_v21 = vrot.slane %v29_v14, %v55_v11  ;;  %v60_v22 = vrot.slane %v29_v14, %v59_v12  ;;  %v64_v23 = vrot.slane %v29_v14, %v63_v13 }
  0x1a   :  { %v68_v24 = vrot.slane %v30_v15, %v35_v4  ;;  %v72_v25 = vrot.slane %v30_v15, %v39_v5  ;;  %v76_v26 = vrot.slane %v30_v15, %v43_v8  ;;  %v80_v27 = vrot.slane %v30_v15, %v47_v9  ;;  %p232_p12 = pnand %p231_p11, %p225_p8 }
  0x1b   :  { %v84_v28 = vrot.slane %v30_v15, %v51_v10  ;;  %v88_v29 = vrot.slane %v30_v15, %v55_v11  ;;  %v92_v30 = vrot.slane %v30_v15, %v59_v12  ;;  %v96_v31 = vrot.slane %v30_v15, %v63_v13 }
  0x1c   :  { %v114_v32 = vsel %vm113_vm0, %v36_v16, -inf  ;;  %v115_v33 = vsel %vm113_vm0, %v40_v17, -inf  ;;  %v116_v34 = vsel %vm113_vm0, %v44_v18, -inf  ;;  %v117_v35 = vsel %vm113_vm0, %v48_v19, -inf }
  0x1d   :  { %v118_v36 = vsel %vm113_vm0, %v52_v20, -inf  ;;  %v120_v37 = vsel %vm113_vm0, %v56_v21, -inf  ;;  %v122_v38 = vsel %vm113_vm0, %v60_v22, -inf  ;;  %v124_v39 = vsel %vm113_vm0, %v64_v23, -inf }
  0x1e   :  { %v119_v40 = vmax.f32 %v114_v32, %v118_v36  ;;  %v121_v41 = vmax.f32 %v115_v33, %v120_v37  ;;  %v123_v42 = vmax.f32 %v116_v34, %v122_v38  ;;  %v125_v43 = vmax.f32 %v117_v35, %v124_v39 }
  0x1f   :  { %v126_v44 = vsel %vm113_vm0, %v68_v24, -inf  ;;  %v128_v45 = vsel %vm113_vm0, %v72_v25, -inf  ;;  %v130_v46 = vsel %vm113_vm0, %v76_v26, -inf  ;;  %v132_v47 = vsel %vm113_vm0, %v80_v27, -inf }
  0x20   :  { %v127_v48 = vmax.f32 %v119_v40, %v126_v44  ;;  %v129_v49 = vmax.f32 %v121_v41, %v128_v45  ;;  %v131_v50 = vmax.f32 %v123_v42, %v130_v46  ;;  %v133_v51 = vmax.f32 %v125_v43, %v132_v47 }
  0x21   :  { %v134_v52 = vsel %vm113_vm0, %v84_v28, -inf  ;;  %v136_v53 = vsel %vm113_vm0, %v88_v29, -inf  ;;  %v138_v54 = vsel %vm113_vm0, %v92_v30, -inf  ;;  %v140_v55 = vsel %vm113_vm0, %v96_v31, -inf }
  0x22   :  { %v135_v56 = vmax.f32 %v127_v48, %v134_v52  ;;  %v137_v57 = vmax.f32 %v129_v49, %v136_v53  ;;  %v139_v58 = vmax.f32 %v131_v50, %v138_v54  ;;  %v141_v59 = vmax.f32 %v133_v51, %v140_v55 }
  0x23   :  { %v23_v10 = vmul.f32 0.01, %v275_v2  ;;  %v24_v11 = vmul.f32 0.01, %v277_v3 }
  0x24   :  { %v142_v60 = vmax.f32 %v135_v56, %v137_v57  ;;  %v143_v61 = vmax.f32 %v139_v58, %v141_v59 }
  0x25   :  { %v25_v12 = vmax.f32 %v275_v2, %v23_v10  ;;  %v26_v13 = vmax.f32 %v277_v3, %v24_v11 }
  0x26   :  { %v144_v62 = vmax.f32 %v142_v60, %v143_v61 }
  0x28   :  { %145 = vmax.xlane.f32.xlu0 %v144_v62 }
  0xb5   :  { %v146_v63 = vpop.xlane.xlu0 %145 }
  0xb6   :  { %v147_v0 = vrot.slane %v146_v63, 4 }
  0xb8   :  { %v148_v1 = vmax.f32 %v146_v63, %v147_v0 }
  0xba   :  { %v149_v4 = vrot.slane %v148_v1, 2 }
  0xbc   :  { %v150_v5 = vmax.f32 %v148_v1, %v149_v4 }
  0xbe   :  { %v151_v6 = vrot.slane %v150_v5, 1 }
  0xc0   :  { %v152_v7 = vmax.f32 %v150_v5, %v151_v6 }
  0xc2   :  { %191 = vpush %v152_v7 }
  0xf3   :  { %s192_s0 = spop %191 }
  0xf4   :  { %s154_s19 = smax.f32 %s251_s18, %s192_s0 }
  0xf5   :  { %v158_v8 = vstv %s154_s19  ;;  %s157_s22 = smul.f32 0.14285715, %s154_s19 }
  0xf6   :  { %200 = vrcp.f32 %v158_v8 }
  0xf7   :  { %v171_v23 = vstv %s157_s22 }
 0x100   :  { %v201_v9 = vpop.eup %200 }
 0x101   :  { %193 = vpush %v201_v9 }
 0x132   :  { %s194_s20 = spop %193 }
 0x133   :  { %s161_s21 = smul.f32 7.0, %s194_s20 }
 0x135   :  { %v162_v14 = vstv %s161_s21 }
 0x136   :  { %v163_v15 = vmul.f32 %v162_v14, %v25_v12  ;;  %v164_v16 = vmul.f32 %v162_v14, %v26_v13 }
 0x138   :  { %v195_v17 = vround.rtne.f32 %v163_v15  ;;  %v196_v18 = vround.rtne.f32 %v164_v16 }
 0x13a   :  { %v167_v19 = vmax.f32 %v195_v17, -8.0  ;;  %v168_v20 = vmax.f32 %v196_v18, -8.0 }
 0x13c   :  { %v169_v21 = vmin.f32 %v167_v19, 7.0  ;;  %v170_v22 = vmin.f32 %v168_v20, 7.0 }
 0x13e   :  { %v172_v24 = vmul.f32 %v171_v23, %v169_v21  ;;  %v173_v25 = vmul.f32 %v171_v23, %v170_v22 }
 0x140   :  { %174 = vst [vmem:[#allocation5] sm:$0xff] %v172_v24  ;;  %175 = vst [vmem:[#allocation5 + $0x8] sm:$0xff] %v173_v25 }
 0x141   :  { %235 = shalt.err (!%p232_p12)
}
 0x142   :  { %s236_s28 = scalar_lea.hbm %s316_s1, 256 }
 0x143   :  { %p237_p13 = scmp.ne.s32.totalorder %s316_s1, %s236_s28  ;;  %p240_p0 = scmp.lt.u32.totalorder %s236_s28, %s316_s1 }
 0x145   :  { %p242_p1 = pnand %p240_p0, %p237_p13 }
 0x147   :  { %245 = shalt.err (!%p242_p1)
}
 0x148   :  { %185 = dma.vmem_to_hbm [thread:$0]  %s183_s24, 256, %s316_s1, [#allocation4]  }
 0x149   :  { %248 = dma.done.wait [#allocation4], 256  }
 0x14a   :  { %249 = vsyncadd [#allocation4], 4294967040 }
 0x14b   :  { %189 = vsyncpa [#allocation3], 1 }
 0x14c   :  { %190 = vsyncpa [#allocation4], 1 }

</bundles_post_ra>
